<compile_context>
chip_gen: v7x
topology: tpu7x:2x2x1
jax: 0.10.0
libtpu: 0.0.40
codegen_flags: <defaults>
</compile_context>

<pallas_src>
import jax
import jax.numpy as jnp
from jax.experimental import pallas as pl
from jax.experimental.pallas import tpu as pltpu

HAND_START = 25
HAND_END = 46
N_HAND = HAND_END - HAND_START  # 21
LANES = 128
SUBLANES = 8
MAX_TILE_ROWS = 512  # rows per grid step once the batch grows large


def _packing_dims(n_elems):
    """Static packed-row count and tile size for n_elems f32 values."""
    rows = -(-n_elems // LANES)                 # ceil to full lanes
    rows = -(-rows // SUBLANES) * SUBLANES      # sublane-align
    if rows > MAX_TILE_ROWS:
        rows = -(-rows // MAX_TILE_ROWS) * MAX_TILE_ROWS
        tile_rows = MAX_TILE_ROWS
    else:
        tile_rows = rows
    return rows, tile_rows


def _pack_lane_dense(flat, rows):
    """Zero-pad a 1-D f32 array to rows*128 and reshape to (rows, 128)."""
    pad = rows * LANES - flat.shape[0]
    return jnp.pad(flat, (0, pad)).reshape(rows, LANES)


def handl3d_kernel(est_ref, const_ref, out_ref):
    """est_ref: (tile_rows, 128) f32.  const_ref: (2, tile_rows, 128) f32 with
    [0]=gt, [1]=conf/(1e-5+sum(conf)) repeated over xyz (zero in padding).
    out_ref: (1, 1) f32 SMEM scalar, resident across the grid (accumulator)."""

    @pl.when(pl.program_id(0) == 0)
    def _init():
        out_ref[0, 0] = jnp.float32(0.0)

    diff = est_ref[...] - const_ref[0]
    # Weights already carry the constant denominator, so the weighted squared
    # error reduces directly to the final scalar loss.
    out_ref[0, 0] += jnp.sum(diff * diff * const_ref[1])


def make_gt_buffers(handl3d):
    """Module-buffer setup (plain JAX, runs once).

    Returns a single packed constant buffer of shape (2, rows, 128):
      [0] root-relative GT, lane-dense, zero-padded
      [1] conf pre-normalized by (1e-5 + sum(conf)), repeated over xyz,
          lane-dense, zero-padded (padding weights are exactly zero).

    NOTE: the denominator is baked in; if the confidence buffer is ever
    updated, these buffers must be re-derived.
    """
    handl3d = handl3d.astype(jnp.float32)
    B = handl3d.shape[0]
    gt = handl3d[..., :3] - handl3d[:, :1, :3]          # (B, 21, 3)
    conf = handl3d[..., -1]                             # (B, 21)
    den = 1e-5 + jnp.sum(conf)                          # constant across calls
    conf_scaled = conf / den                            # (B, 21)
    conf3 = jnp.repeat(conf_scaled[..., None], 3, axis=-1)  # (B, 21, 3)

    n_elems = B * N_HAND * 3
    rows, _ = _packing_dims(n_elems)
    gt_p = _pack_lane_dense(gt.reshape(-1), rows)        # (rows, 128)
    w_p = _pack_lane_dense(conf3.reshape(-1), rows)      # (rows, 128)
    return jnp.stack([gt_p, w_p], axis=0)                # (2, rows, 128)


def handl3d_loss(kpts_est, const_packed):
    """Pallas-backed Handl3D.forward. Returns a scalar float32 loss."""
    B = kpts_est.shape[0]
    n_elems = B * N_HAND * 3
    rows, tile_rows = _packing_dims(n_elems)
    assert const_packed.shape == (2, rows, LANES), (
        "constant buffer does not match the batch size of kpts_est")
    num_tiles = rows // tile_rows

    # Slice the hand joints and make them root-relative in XLA (fuses with the
    # producer of kpts_est; avoids a non-8-aligned sublane slice in-kernel).
    est = kpts_est[:, HAND_START:HAND_END, :].astype(jnp.float32)
    est = est - est[:, :1, :]
    est = _pack_lane_dense(est.reshape(-1), rows)        # lane-dense (rows, 128)

    out = pl.pallas_call(
        handl3d_kernel,
        out_shape=jax.ShapeDtypeStruct((1, 1), jnp.float32),
        grid=(num_tiles,),
        in_specs=[
            pl.BlockSpec((tile_rows, LANES), lambda i: (i, 0)),       # est
            pl.BlockSpec((2, tile_rows, LANES), lambda i: (0, i, 0)),  # gt+w
        ],
        out_specs=pl.BlockSpec(memory_space=pltpu.MemorySpace.SMEM),
        compiler_params=pltpu.CompilerParams(
            dimension_semantics=("arbitrary",)),
        cost_estimate=pl.CostEstimate(
            flops=4 * rows * LANES,
            transcendentals=0,
            bytes_accessed=3 * rows * LANES * 4 + 4,
        ),
    )(est, const_packed)
    return out[0, 0]


def reference_loss(kpts_est, handl3d):
    """Pure-JAX reference of the PyTorch forward (independent of the packing)."""
    handl3d = handl3d.astype(jnp.float32)
    gt = handl3d[..., :3] - handl3d[:, :1, :3]
    conf = handl3d[..., -1]
    est = kpts_est[:, HAND_START:HAND_END]
    est = est - est[:, :1]
    sq = jnp.sum((est - gt) ** 2, axis=-1)
    return jnp.sum(sq * conf) / (1e-5 + jnp.sum(conf))


if __name__ == "__main__":
    key = jax.random.PRNGKey(0)
    k1, k2 = jax.random.split(key)

    B = 2          # batch of frames
    J_TOTAL = 64   # total body joints (>= 46 so the 25:46 hand slice exists)

    # Estimated body keypoints (B, J_total, 3)
    kpts_est = jax.random.normal(k1, (B, J_TOTAL, 3), dtype=jnp.float32)

    # Detected left-hand keypoints with confidence (B, 21, 4) — "buffer" init.
    handl3d = jax.random.uniform(k2, (B, N_HAND, 4), dtype=jnp.float32)

    const_packed = make_gt_buffers(handl3d)

    loss = handl3d_loss(kpts_est, const_packed)
    loss = jax.block_until_ready(loss)

    ref = reference_loss(kpts_est, handl3d)
    assert jnp.allclose(loss, ref, rtol=1e-5, atol=1e-6), (loss, ref)

    print("KERNEL_OK")
</pallas_src>

<mosaic_0001>
module attributes {stable_mosaic.version = 11 : i64} {
  func.func @handl3d_kernel(%arg0: i32, %arg1: memref<8x128xf32, #tpu.memory_space<vmem>>, %arg2: memref<2x8x128xf32, #tpu.memory_space<vmem>>, %arg3: memref<1x1xf32, #tpu.memory_space<smem>>) attributes {dimension_semantics = [#tpu.dimension_semantics<arbitrary>], iteration_bounds = array<i64: 1>, scalar_prefetch = 0 : i64, scratch_operands = 0 : i64, tpu.core_type = #tpu.core_type<tc>, window_params = [{transform_indices = @transform_0, window_bounds = array<i64: 8, 128>}, {transform_indices = @transform_1, window_bounds = array<i64: 2, 8, 128>}, {transform_indices = @transform_2, window_bounds = array<i64: 1, 1>}]} {
    %c0_i32 = arith.constant 0 : i32
    %0 = arith.cmpi eq, %arg0, %c0_i32 : i32
    %1 = arith.extui %0 : i1 to i32
    %c0_i32_0 = arith.constant 0 : i32
    %2 = arith.cmpi ne, %1, %c0_i32_0 : i32
    scf.if %2 {
      %cst_11 = arith.constant 0.000000e+00 : f32
      %c0_12 = arith.constant 0 : index
      %c0_13 = arith.constant 0 : index
      %18 = memref.load %arg3[%c0_12, %c0_13] : memref<1x1xf32, #tpu.memory_space<smem>>
      memref.store %cst_11, %arg3[%c0_12, %c0_13] : memref<1x1xf32, #tpu.memory_space<smem>>
    } else {
    }
    %c0 = arith.constant 0 : index
    %c0_1 = arith.constant 0 : index
    %3 = vector.load %arg1[%c0, %c0_1] : memref<8x128xf32, #tpu.memory_space<vmem>>, vector<8x128xf32>
    %c0_2 = arith.constant 0 : index
    %c0_3 = arith.constant 0 : index
    %c0_4 = arith.constant 0 : index
    %4 = vector.load %arg2[%c0_2, %c0_3, %c0_4] : memref<2x8x128xf32, #tpu.memory_space<vmem>>, vector<1x8x128xf32>
    %5 = vector.shape_cast %4 : vector<1x8x128xf32> to vector<8x128xf32>
    %6 = arith.subf %3, %5 : vector<8x128xf32>
    %c0_5 = arith.constant 0 : index
    %c0_6 = arith.constant 0 : index
    %7 = memref.load %arg3[%c0_5, %c0_6] : memref<1x1xf32, #tpu.memory_space<smem>>
    %8 = arith.mulf %6, %6 : vector<8x128xf32>
    %c1 = arith.constant 1 : index
    %c0_7 = arith.constant 0 : index
    %c0_8 = arith.constant 0 : index
    %9 = vector.load %arg2[%c1, %c0_7, %c0_8] : memref<2x8x128xf32, #tpu.memory_space<vmem>>, vector<1x8x128xf32>
    %10 = vector.shape_cast %9 : vector<1x8x128xf32> to vector<8x128xf32>
    %11 = arith.mulf %8, %10 : vector<8x128xf32>
    %12 = vector.shape_cast %11 : vector<8x128xf32> to vector<1x8x128xf32>
    %cst = arith.constant dense<0.000000e+00> : vector<1xf32>
    %13 = vector.multi_reduction <add>, %12, %cst [1, 2] : vector<1x8x128xf32> to vector<1xf32>
    %14 = vector.shape_cast %13 : vector<1xf32> to vector<1x1x1xf32>
    %15 = vector.extract %14[0, 0, 0] : f32 from vector<1x1x1xf32>
    %16 = arith.addf %7, %15 : f32
    %c0_9 = arith.constant 0 : index
    %c0_10 = arith.constant 0 : index
    %17 = memref.load %arg3[%c0_9, %c0_10] : memref<1x1xf32, #tpu.memory_space<smem>>
    memref.store %16, %arg3[%c0_9, %c0_10] : memref<1x1xf32, #tpu.memory_space<smem>>
    return
  }
  func.func @transform_0(%arg0: i32) -> (i32, i32) {
    %c0_i32 = arith.constant 0 : i32
    %c0_i32_0 = arith.constant 0 : i32
    return %arg0, %c0_i32 : i32, i32
  }
  func.func @transform_1(%arg0: i32) -> (i32, i32, i32) {
    %c0_i32 = arith.constant 0 : i32
    %c0_i32_0 = arith.constant 0 : i32
    %c0_i32_1 = arith.constant 0 : i32
    return %c0_i32, %arg0, %c0_i32_0 : i32, i32, i32
  }
  func.func @transform_2(%arg0: i32) -> (i32, i32) {
    %c0_i32 = arith.constant 0 : i32
    %c0_i32_0 = arith.constant 0 : i32
    %c0_i32_1 = arith.constant 0 : i32
    return %c0_i32, %c0_i32_0 : i32, i32
  }
}

</mosaic_0001>

<bundles_post_ra>
// kernel: tpu_custom_call.1
= control target key start
LH: loop header
LB: loop body
LE: loop exit
PB: predicated region body
PF: predicated region fallthrough
CT: control target
= control target key end

     0   :  { %7 = vsyncpa [#allocation3], 0  ;;  %s210_s0 = inlined_call_operand.hbm [shape: f32[8,128], index: 0, kind: input, shape index: {}]   ;;  %s211_s1 = inlined_call_operand.hbm [shape: f32[2,8,128], index: 1, kind: input, shape index: {}]   ;;  %s212_s2 = inlined_call_operand.hbm [shape: f32[1,1], index: 2, kind: output, shape index: {}]  }
   0x1   :  { %8 = vsyncpa [#allocation6], 0 }
   0x2   :  { %9 = vsyncpa [#allocation4], 0  ;;  %s147_s9 = smov [#allocation2]   ;;  %s148_s11 = smov [#allocation5]  }
   0x3   :  { %s16_s10 = sshll.u32 %s147_s9, 4  ;;  %s25_s12 = sshll.u32 %s148_s11, 4  ;;  %s17_s10 = int_to_ptr.vmem [resolvable:$true] %s16_s10  ;;  %s167_s12 = int_to_ptr.vmem [resolvable:$true] %s25_s12 }
   0x4   :  { %s87_s15 = scalar_lea.hbm %s210_s0, 128 }
   0x5   :  { %p88_p0 = scmp.ne.s32.totalorder %s210_s0, %s87_s15  ;;  %p91_p1 = scmp.lt.u32.totalorder %s87_s15, %s210_s0 }
   0x7   :  { %p93_p2 = pnand %p91_p1, %p88_p0 }
   0x9   :  { %96 = shalt.err (!%p93_p2)
}
   0xa   :  { %s97_s20 = scalar_lea.vmem %s17_s10, 128  ;;  %p102_p4 = scmp.lt.s32.totalorder %s17_s10, %s17_s10 }
   0xb   :  { %p98_p3 = scmp.ne.s32.totalorder %s17_s10, %s97_s20  ;;  %p103_p5 = scmp.lt.s32.totalorder %s97_s20, %s97_s20 }
   0xd   :  { %p104_p6 = por %p103_p5, %p102_p4 }
   0xf   :  { %p105_p7 = pnand %p104_p6, %p98_p3 }
  0x11   :  { %108 = shalt.err (!%p105_p7)
}
  0x12   :  { %19 = dma.hbm_to_vmem [thread:$0]  %s210_s0, 128, %s17_s10, [#allocation3]  }
  0x13   :  { %s109_s25 = scalar_lea.hbm %s211_s1, 256 }
  0x14   :  { %p110_p8 = scmp.ne.s32.totalorder %s211_s1, %s109_s25  ;;  %p113_p9 = scmp.lt.u32.totalorder %s109_s25, %s211_s1 }
  0x16   :  { %p115_p10 = pnand %p113_p9, %p110_p8 }
  0x18   :  { %118 = shalt.err (!%p115_p10)
}
  0x19   :  { %s119_s30 = scalar_lea.vmem %s167_s12, 256  ;;  %p124_p12 = scmp.lt.s32.totalorder %s167_s12, %s167_s12 }
  0x1a   :  { %p120_p11 = scmp.ne.s32.totalorder %s167_s12, %s119_s30  ;;  %p125_p13 = scmp.lt.s32.totalorder %s119_s30, %s119_s30 }
  0x1c   :  { %p126_p0 = por %p125_p13, %p124_p12 }
  0x1e   :  { %p127_p1 = pnand %p126_p0, %p120_p11 }
  0x20   :  { %130 = shalt.err (!%p127_p1)
}
  0x21   :  { %s149_s0 = smov 128   ;;  %s150_s3 = smov 8  }
  0x22   :  { %31 = dma.hbm_to_vmem [thread:$0]  %s211_s1, 256, %s167_s12, [#allocation6], %s149_s0, %s149_s0, %s150_s3  }
  0x23   :  { %141 = dma.done.wait [#allocation3], 128  }
  0x24   :  { %142 = vsyncadd [#allocation3], 4294967168 }
  0x25   :  { %143 = dma.done.wait [#allocation6], 256  }
  0x26   :  { %144 = vsyncadd [#allocation6], 4294967040  ;;  %v44_v0 = vld [vmem:[#allocation2] sm:$0xff]  ;;  %v45_v1 = vld [vmem:[#allocation5] sm:$0xff]  ;;  %s131_s8 = scalar_lea.hbm %s212_s2, 16 }
  0x27   :  { %v46_v2 = vsub.f32 %v44_v0, %v45_v1  ;;  %v50_v3 = vld [vmem:[#allocation5 + $0x8] sm:$0xff]  ;;  %p132_p2 = scmp.ne.s32.totalorder %s212_s2, %s131_s8  ;;  %p135_p3 = scmp.lt.u32.totalorder %s131_s8, %s212_s2 }
  0x29   :  { %v48_v4 = vmul.f32 %v46_v2, %v46_v2  ;;  %p137_p4 = pnand %p135_p3, %p132_p2 }
  0x2b   :  { %v51_v5 = vmul.f32 %v50_v3, %v48_v4 }
  0x2d   :  { %52 = vadd.xlane.f32.xlu0 %v51_v5 }
  0xba   :  { %v53_v6 = vpop.xlane.xlu0 %52 }
  0xbb   :  { %v54_v7 = vrot.slane %v53_v6, 4 }
  0xbd   :  { %v55_v8 = vadd.f32 %v54_v7, %v53_v6 }
  0xbf   :  { %v56_v9 = vrot.slane %v55_v8, 2 }
  0xc1   :  { %v57_v10 = vadd.f32 %v56_v9, %v55_v8 }
  0xc3   :  { %v58_v11 = vrot.slane %v57_v10, 1 }
  0xc5   :  { %v59_v12 = vadd.f32 %v58_v11, %v57_v10 }
  0xc7   :  { %79 = vpush %v59_v12 }
  0xf8   :  { %s80_s1 = spop %79 }
  0xf9   :  { %63 = sst [smem:[#allocation7]] %s80_s1 }
  0xfa   :  { %140 = shalt.err (!%p137_p4)
}
  0xfb   :  { %s151_s13 = smov [#allocation7]  }
  0xfc   :  { %71 = dma.smem_to_hbm %s151_s13, 16, %s212_s2, [#allocation4]  }
  0xfd   :  { %145 = dma.done.wait [#allocation4], 16  }
  0xfe   :  { %146 = vsyncadd [#allocation4], 4294967280 }
  0xff   :  { %75 = sfence }
 0x100   :  { %76 = vsyncpa [#allocation3], 1 }
 0x101   :  { %77 = vsyncpa [#allocation6], 1 }
 0x102   :  { %78 = vsyncpa [#allocation4], 1 }

</bundles_post_ra>
